<compile_context>
chip_gen: v7x
topology: tpu7x:2x2x1
jax: 0.10.0
libtpu: 0.0.40
codegen_flags: <defaults>
</compile_context>

<pallas_src>
import jax
import jax.numpy as jnp
from jax.experimental import pallas as pl
from jax.experimental.pallas import tpu as pltpu

LANE = 128            # vreg lane width
MAX_TILE_ROWS = 2048  # 2048 x 128 x 4B = 1 MiB/block; x2 arrays x2 buffers = 4 MiB
                      # -> fits the 16/32 MiB scoped-VMEM defaults on all gens
SMALL_N = 65536       # below this, XLA's fused elementwise beats pallas launch cost


def _round_up(x, m):
    return ((x + m - 1) // m) * m


def _linear1x1_kernel(w_ref, b_ref, x_ref, o_ref):
    # w_ref, b_ref: (1, 1) scalars in SMEM.
    # x_ref, o_ref: (tile_rows, 128) VMEM tiles (last block may be partial).
    w = w_ref[0, 0]
    b = b_ref[0, 0]
    o_ref[...] = (x_ref[...].astype(jnp.float32) * w + b).astype(o_ref.dtype)


def _linear1x1_pallas_slab(x2d, w_s, b_s):
    """x2d: (rows, 128) lane-dense slab. Returns x2d * w + b via Pallas."""
    rows = x2d.shape[0]

    if rows < 8:
        # Full-array block (legal: equals the array dim), single step.
        tile_rows = rows
    else:
        # Multiple of 8, <= rows, capped for VMEM, and small enough that the
        # grid has >= 2 steps (lets v7x shard the "parallel" axis over 2 TCs).
        tile_rows = min(MAX_TILE_ROWS, _round_up(-(-rows // 2), 8))

    grid = (pl.cdiv(rows, tile_rows),)

    return pl.pallas_call(
        _linear1x1_kernel,
        out_shape=jax.ShapeDtypeStruct(x2d.shape, x2d.dtype),
        grid=grid,
        in_specs=[
            pl.BlockSpec(memory_space=pltpu.SMEM),              # weight scalar
            pl.BlockSpec(memory_space=pltpu.SMEM),              # bias scalar
            pl.BlockSpec((tile_rows, LANE), lambda i: (i, 0)),  # x tile
        ],
        out_specs=pl.BlockSpec((tile_rows, LANE), lambda i: (i, 0)),
        compiler_params=pltpu.CompilerParams(
            dimension_semantics=("parallel",),
        ),
    )(w_s, b_s, x2d)


def linear1x1(x, weight, bias, *, force_pallas=False):
    """x: (N, 1); weight: (1, 1); bias: (1,). Returns (N, 1) = x @ W^T + b."""
    n = x.shape[0]
    dtype = x.dtype

    w_s = weight.reshape(1, 1).astype(jnp.float32)
    b_s = bias.reshape(1, 1).astype(jnp.float32)

    if n == 0:
        return jnp.zeros((0, 1), dtype)

    def jnp_path(v):
        return (v.astype(jnp.float32) * w_s[0, 0] + b_s[0, 0]).astype(dtype)

    n_main = (n // LANE) * LANE  # lane-aligned prefix handled by Pallas

    # Fast path: tiny inputs (pallas launch + DMA setup would dominate), or
    # inputs with no full 128-lane chunk at all.
    if (not force_pallas and n < SMALL_N) or n_main == 0:
        return jnp_path(x)

    x_flat = x.reshape(-1)  # free reshape (contiguous)
    rows = n_main // LANE

    if n_main == n:
        # No pad, no slice: pure reshapes around the kernel.
        x2d = x_flat.reshape(rows, LANE)
        out2d = _linear1x1_pallas_slab(x2d, w_s, b_s)
        return out2d.reshape(n, 1)

    # Ragged N: Pallas on the aligned prefix, tiny jnp op on the (<128) tail.
    # Avoids a full-array pad pass and never rounds rows up to a tile multiple.
    x2d = x_flat[:n_main].reshape(rows, LANE)
    out_main = _linear1x1_pallas_slab(x2d, w_s, b_s).reshape(n_main, 1)
    tail = jnp_path(x_flat[n_main:].reshape(-1, 1))
    return jnp.concatenate([out_main, tail], axis=0)


if __name__ == "__main__":
    key = jax.random.PRNGKey(0)
    kx, kw, kb = jax.random.split(key, 3)

    # Deterministic parameter init mirroring nn.Linear(1, 1):
    # uniform(-1/sqrt(fan_in), 1/sqrt(fan_in)) with fan_in = 1 -> U(-1, 1).
    weight = jax.random.uniform(kw, (1, 1), jnp.float32, minval=-1.0, maxval=1.0)
    bias = jax.random.uniform(kb, (1,), jnp.float32, minval=-1.0, maxval=1.0)

    def ref_fn(v):
        return v @ weight.T + bias

    # 1) Small batch consistent with Linear(1, 1): (8, 1). Uses the fused-jnp
    #    fast path (pallas launch overhead would dominate at this size).
    x_small = jax.random.normal(kx, (8, 1), jnp.float32)
    out_small = jax.block_until_ready(linear1x1(x_small, weight, bias))
    assert out_small.shape == (8, 1)
    assert jnp.allclose(out_small, ref_fn(x_small), atol=1e-6)

    # 2) Pallas path, lane-aligned N (N % 128 == 0): zero pad/slice passes.
    x_aligned = jax.random.normal(kx, (8192, 1), jnp.float32)
    out_aligned = jax.block_until_ready(
        linear1x1(x_aligned, weight, bias, force_pallas=True))
    assert out_aligned.shape == (8192, 1)
    assert jnp.allclose(out_aligned, ref_fn(x_aligned), atol=1e-6)

    # 3) Pallas path with a ragged tail (N % 128 != 0): prefix slab + jnp tail.
    x_ragged = jax.random.normal(kx, (5000, 1), jnp.float32)
    out_ragged = jax.block_until_ready(
        linear1x1(x_ragged, weight, bias, force_pallas=True))
    assert out_ragged.shape == (5000, 1)
    assert jnp.allclose(out_ragged, ref_fn(x_ragged), atol=1e-6)

    print("KERNEL_OK")
</pallas_src>

<mosaic_0001>
module attributes {stable_mosaic.version = 11 : i64} {
  func.func @_linear1x1_kernel(%arg0: i32, %arg1: memref<1x1xf32, #tpu.memory_space<smem>>, %arg2: memref<1x1xf32, #tpu.memory_space<smem>>, %arg3: memref<32x128xf32, #tpu.memory_space<vmem>>, %arg4: memref<32x128xf32, #tpu.memory_space<vmem>>) attributes {dimension_semantics = [#tpu.dimension_semantics<parallel>], iteration_bounds = array<i64: 2>, scalar_prefetch = 0 : i64, scratch_operands = 0 : i64, tpu.core_type = #tpu.core_type<tc>, window_params = [{transform_indices = @transform_0, window_bounds = array<i64: 1, 1>}, {transform_indices = @transform_1, window_bounds = array<i64: 1, 1>}, {transform_indices = @transform_2, window_bounds = array<i64: 32, 128>}, {transform_indices = @transform_3, window_bounds = array<i64: 32, 128>}]} {
    %c0 = arith.constant 0 : index
    %c0_0 = arith.constant 0 : index
    %0 = memref.load %arg1[%c0, %c0_0] : memref<1x1xf32, #tpu.memory_space<smem>>
    %c0_1 = arith.constant 0 : index
    %c0_2 = arith.constant 0 : index
    %1 = memref.load %arg2[%c0_1, %c0_2] : memref<1x1xf32, #tpu.memory_space<smem>>
    %c0_3 = arith.constant 0 : index
    %c0_4 = arith.constant 0 : index
    %2 = vector.load %arg3[%c0_3, %c0_4] : memref<32x128xf32, #tpu.memory_space<vmem>>, vector<32x128xf32>
    %3 = vector.broadcast %0 : f32 to vector<32x128xf32>
    %4 = arith.mulf %2, %3 : vector<32x128xf32>
    %5 = vector.broadcast %1 : f32 to vector<32x128xf32>
    %6 = arith.addf %4, %5 : vector<32x128xf32>
    %c0_5 = arith.constant 0 : index
    %c0_6 = arith.constant 0 : index
    %7 = vector.load %arg4[%c0_5, %c0_6] : memref<32x128xf32, #tpu.memory_space<vmem>>, vector<32x128xf32>
    tpu.vector_store %arg4[%c0_5, %c0_6], %6 {strides = array<i32>} : memref<32x128xf32, #tpu.memory_space<vmem>>, vector<32x128xf32>,
    return
  }
  func.func @transform_0(%arg0: i32) -> (i32, i32) {
    %c0_i32 = arith.constant 0 : i32
    %c0_i32_0 = arith.constant 0 : i32
    %c0_i32_1 = arith.constant 0 : i32
    return %c0_i32, %c0_i32_0 : i32, i32
  }
  func.func @transform_1(%arg0: i32) -> (i32, i32) {
    %c0_i32 = arith.constant 0 : i32
    %c0_i32_0 = arith.constant 0 : i32
    %c0_i32_1 = arith.constant 0 : i32
    return %c0_i32, %c0_i32_0 : i32, i32
  }
  func.func @transform_2(%arg0: i32) -> (i32, i32) {
    %c0_i32 = arith.constant 0 : i32
    %c0_i32_0 = arith.constant 0 : i32
    return %arg0, %c0_i32 : i32, i32
  }
  func.func @transform_3(%arg0: i32) -> (i32, i32) {
    %c0_i32 = arith.constant 0 : i32
    %c0_i32_0 = arith.constant 0 : i32
    return %arg0, %c0_i32 : i32, i32
  }
}

</mosaic_0001>

<bundles_post_ra>
// kernel: tpu_custom_call.1
= control target key start
LH: loop header
LB: loop body
LE: loop exit
PB: predicated region body
PF: predicated region fallthrough
CT: control target
= control target key end

     0   :  { %s658_s0 = inlined_call_operand.<no memory space> [shape: f32[1,1], index: 0, kind: input, shape index: {}]   ;;  %s659_s1 = inlined_call_operand.<no memory space> [shape: f32[1,1], index: 1, kind: input, shape index: {}]   ;;  %s660_s2 = inlined_call_operand.hbm [shape: f32[64,128], index: 2, kind: input, shape index: {}]   ;;  %s661_s3 = inlined_call_operand.hbm [shape: f32[64,128], index: 3, kind: output, shape index: {}]  }
   0x1   :  { %8 = sst [smem:[#allocation2]] %s658_s0 }
   0x2   :  { %9 = sst [smem:[#allocation3]] %s659_s1 }
   0x3   :  { %10 = vsyncpa [#allocation5], 0 }
   0x4   :  { %12 = vsyncpa [#allocation5 + $0x1], 0 }
   0x5   :  { %13 = vsyncpa [#allocation6], 0 }
   0x6   :  { %15 = vsyncpa [#allocation6 + $0x1], 0  ;;  %s496_s16 = smov 0   ;;  %s498_s17 = smov 0  }
   0x7   :  { %s500_s18 = smov 0   ;;  %s502_s19 = smov 0  }
   0x8 LB: > { %s517_s0 = sadd.s32 4294967295, %s462_s19   ;;  %s300_s1 = sadd.s32 4294967294, %s462_s19   ;;  %s462_s19 = sphi %s502_s19, %s674_s19   ;;  %s458_s18 = sphi %s500_s18, %s673_s18   ;;  %s454_s17 = sphi %s498_s17, %s672_s17   ;;  %s450_s16 = sphi %s496_s16, %s671_s16  }
   0x9   : > { %s521_s20 = sadd.s32 1, %s462_s19   ;;  %s70_s21 = sadd.s32 1, %s458_s18 }
   0xa   : > { %s67_s22 = ssub.s32 %s462_s19, %s521_s20  ;;  %p77_p0 = scmp.ne.s32.totalorder %s458_s18, %s454_s17 }
   0xb   : > { %p68_p1 = scmp.eq.s32.totalorder %s67_s22, 0  ;;  %p78_p2 = scmp.eq.s32.totalorder %s462_s19, 0 }
   0xc   : > { %p83_p3 = scmp.ne.s32.totalorder %s454_s17, %s450_s16  ;;  %p84_p4 = scmp.eq.s32.totalorder %s517_s0, 0 }
   0xd   : > { %s533_s23 = scalar_select %p68_p1, %s458_s18, %s70_s21  }
   0xe   : > { %p535_p5 = por %p78_p2, %p77_p0  ;;  %p539_p6 = por %p84_p4, %p83_p3 }
   0xf   : > { %p107_p7 = scmp.eq.s32.totalorder %s517_s0, 1  ;;  %p113_p8 = scmp.eq.s32.totalorder %s300_s1, 1 }
  0x10   : > { %p328_p10 = scmp.lt.s32.totalorder %s462_s19, 2  ;;  %s139_s28 = sand.u32 1, %s458_s18  }
  0x11   : > { %p546_p11 = por %p107_p7, %p77_p0  ;;  %p550_p12 = por %p113_p8, %p83_p3 }
  0x12   : > { %s314_s29 = sshll.u32 %s462_s19, 9  ;;  %s303_s30 = sshll.u32 %s139_s28, 5 }
  0x13   : > { %s665_s26 = scalar_select %p546_p11, 1, 0 }
  0x14   : > { %s666_s27 = scalar_select %p550_p12, 1, 0 }
  0x15   : > { %s559_s6 = scalar_lea.hbm %s660_s2, %s314_s29  ;;  %s143_s7 = scalar_lea.vmem [#allocation4], %s303_s30 }
  0x16   : > { %s150_s8 = sshll.u32 %s143_s7, 4  ;;  %p563_p13 = pnand %p328_p10, %p535_p5  ;;  %s567_s8 = int_to_ptr.vmem [resolvable:$true] %s150_s8 }
  0x17   : > { %s569_s10 = scalar_lea.sflag [#allocation5], %s139_s28  ;;  %s366_s11 = scalar_lea.hbm %s559_s6, 512 }
  0x18   : > { %p367_p0 = scmp.ne.s32.totalorder %s559_s6, %s366_s11  ;;  %p368_p1 = pneg %p563_p13 }
  0x19   : > { %s371_s14 = scalar_lea.hbm %s660_s2, 1024  ;;  %p372_p4 = scmp.lt.u32.totalorder %s559_s6, %s660_s2 }
  0x1a   : > { %p369_p2 = pnand %p368_p1, %p367_p0  ;;  %p373_p5 = scmp.lt.u32.totalorder %s371_s14, %s366_s11 }
  0x1b   : > { %p375_p8 = scmp.lt.u32.totalorder %s366_s11, %s559_s6 }
  0x1c   : > { %p370_p3 = pneg %p369_p2  ;;  %p374_p7 = por %p373_p5, %p372_p4 }
  0x1e   : > { %p376_p10 = por %p375_p8, %p374_p7 }
  0x20   : > { %p377_p9 = pnand %p376_p10, %p370_p3 }
  0x22   : > { %380 = shalt.err (!%p377_p9)
}
  0x23   : > { %s381_s21 = scalar_lea.vmem %s567_s8, 512  ;;  %s464_s22 = smov [#allocation4]  }
  0x24   : > { %p382_p0 = scmp.ne.s32.totalorder %s567_s8, %s381_s21  ;;  %s386_s24 = sshll.u32 %s464_s22, 4  ;;  %s387_s24 = int_to_ptr.vmem [resolvable:$false] %s386_s24 }
  0x25   : > { %s388_s28 = scalar_lea.vmem %s387_s24, 1024  ;;  %p389_p11 = scmp.lt.s32.totalorder %s567_s8, %s387_s24 }
  0x26   : > { %p384_p2 = pnand %p382_p0, %p368_p1  ;;  %p390_p4 = scmp.lt.s32.totalorder %s388_s28, %s381_s21 }
  0x28   : > { %p385_p12 = pneg %p384_p2  ;;  %p391_p5 = por %p390_p4, %p389_p11 }
  0x2a   : > { %p392_p7 = pnand %p391_p5, %p385_p12 }
  0x2c   : > { %395 = shalt.err (!%p392_p7)
}
  0x2d   : > { %s465_s29 = smov 128   ;;  %s466_s30 = smov 8  }
  0x2e   : > { %323 = dma.hbm_to_vmem [thread:$0]  (!%p563_p13), %s559_s6, 512, %s567_s8, %s569_s10, %s465_s29, %s465_s29, %s466_s30  }
  0x2f   : > { %p306_p9 = scmp.ge.s32.totalorder %s462_s19, 1  ;;  %p158_p1 = scmp.lt.s32.totalorder %s462_s19, 3 }
  0x31   : > { %p159_p3 = pnand %p306_p9, %p158_p1 }
  0x32   : > { %s600_s4 = sand.u32 (!%p159_p3), 1, %s454_s17  }
  0x33   : > { %162 = sbr.rel (%p159_p3) target bundleno = 87 (0x57), region = 32  ;;  %s307_s5 = sshll.u32 (!%p159_p3), %s600_s4, 5 }
  0x34   : > { %s165_s7 = scalar_lea.sflag (!%p159_p3), [#allocation5], %s600_s4  ;;  %s168_s11 = scalar_lea.vmem (!%p159_p3), [#allocation4], %s307_s5 }
  0x3a   : > { %441 = dma.done.wait (%p539_p6), %s165_s7, 512  }
  0x3b   : > { %443 = vsyncadd (%p539_p6), %s165_s7, 4294966784  ;;  %s193_s6 = sld [smem:[#allocation2]]  ;;  %v195_v0 = vld [vmem:[%s168_s11] sm:$0xff]  ;;  %s190_s9 = scalar_lea.vmem [#allocation7], %s307_s5  ;;  %v196_v3 = vld [vmem:[%s168_s11 + $0x8] sm:$0xff] }
  0x3c   : > { %s194_s8 = sld [smem:[#allocation3]]  ;;  %s227_s10 = sshll.u32 %s190_s9, 4  ;;  %v197_v6 = vld [vmem:[%s168_s11 + $0x10] sm:$0xff]  ;;  %v198_v7 = vld [vmem:[%s168_s11 + $0x18] sm:$0xff]  ;;  %s609_s10 = int_to_ptr.vmem [resolvable:$true] %s227_s10 }
  0x3d   : > { %s315_s12 = sshll.u32 %s517_s0, 9  ;;  %s214_s0 = scalar_lea.sflag [#allocation6], %s600_s4 }
  0x3e   : > { %s614_s14 = scalar_lea.hbm %s661_s3, %s315_s12  ;;  %s396_s15 = scalar_lea.vmem %s609_s10, 512 }
  0x3f   : > { %p397_p6 = scmp.ne.s32.totalorder %s609_s10, %s396_s15  ;;  %p668_p11 = scmp.ne.s32.totalorder %s665_s26, 0 }
  0x40   : > { %s467_s1 = smov [#allocation7]  }
  0x41   : > { %v199_v1 = vstv %s193_s6  ;;  %p398_p12 = pnand %p397_p6, %p668_p11  ;;  %s400_s21 = sshll.u32 %s467_s1, 4  ;;  %s401_s21 = int_to_ptr.vmem [resolvable:$false] %s400_s21 }
  0x42   : > { %v204_v2 = vstv %s194_s8  ;;  %v200_v4 = vmul.f32 %v199_v1, %v195_v0  ;;  %v201_v5 = vmul.f32 %v199_v1, %v196_v3  ;;  %v202_v8 = vmul.f32 %v199_v1, %v197_v6  ;;  %s402_s22 = scalar_lea.vmem %s401_s21, 1024  ;;  %p403_p8 = scmp.lt.s32.totalorder %s609_s10, %s401_s21 }
  0x43   : > { %v203_v9 = vmul.f32 %v199_v1, %v198_v7  ;;  %p399_p13 = pneg %p398_p12  ;;  %p404_p10 = scmp.lt.s32.totalorder %s402_s22, %s396_s15 }
  0x44   : > { %v205_v10 = vadd.f32 %v204_v2, %v200_v4  ;;  %v206_v11 = vadd.f32 %v204_v2, %v201_v5  ;;  %v207_v12 = vadd.f32 %v204_v2, %v202_v8 }
  0x45   : > { %v208_v13 = vadd.f32 %v204_v2, %v203_v9  ;;  %p405_p0 = por %p404_p10, %p403_p8 }
  0x46   : > { %209 = vst [vmem:[%s190_s9] sm:$0xff] %v205_v10  ;;  %210 = vst [vmem:[%s190_s9 + $0x8] sm:$0xff] %v206_v11 }
  0x47   : > { %211 = vst [vmem:[%s190_s9 + $0x10] sm:$0xff] %v207_v12  ;;  %212 = vst [vmem:[%s190_s9 + $0x18] sm:$0xff] %v208_v13  ;;  %p406_p2 = pnand %p405_p0, %p399_p13 }
  0x49   : > { %409 = shalt.err (!%p406_p2)
}
  0x4a   : > { %s410_s24 = scalar_lea.hbm %s614_s14, 512  ;;  %s414_s30 = scalar_lea.hbm %s661_s3, 1024 }
  0x4b   : > { %p411_p4 = scmp.ne.s32.totalorder %s614_s14, %s410_s24  ;;  %p415_p9 = scmp.lt.u32.totalorder %s614_s14, %s661_s3 }
  0x4c   : > { %p416_p1 = scmp.lt.u32.totalorder %s414_s30, %s410_s24  ;;  %p418_p6 = scmp.lt.u32.totalorder %s410_s24, %s614_s14 }
  0x4d   : > { %p412_p5 = pnand %p411_p4, %p668_p11 }
  0x4e   : > { %p417_p3 = por %p416_p1, %p415_p9 }
  0x4f   : > { %p413_p7 = pneg %p412_p5 }
  0x50   : > { %p419_p12 = por %p418_p6, %p417_p3 }
  0x52   : > { %p420_p13 = pnand %p419_p12, %p413_p7 }
  0x54   : > { %423 = shalt.err (!%p420_p13)
}
  0x55   : > { %s468_s11 = smov 128   ;;  %s469_s6 = smov 8  }
  0x56   : > { %318 = dma.vmem_to_hbm [thread:$0]  (%p668_p11), %s609_s10, 512, %s614_s14, %s214_s0, %s468_s11, %s468_s11, %s469_s6  }
  0x57 PF: > { %s242_s8 = sand.u32 1, %s450_s16   ;;  %p669_p8 = scmp.ne.s32.totalorder %s666_s27, 0 }
  0x58   : > { %p670_p10 = scmp.ge.s32.totalorder %s462_s19, 2  ;;  %s243_s9 = scalar_lea.sflag [#allocation6], %s242_s8 }
  0x5a   : > { %p325_p0 = pnand %p670_p10, %p669_p8 }
  0x5c   : > { %445 = dma.done.wait (!%p325_p0), %s243_s9, 512  }
  0x5d   : > { %447 = vsyncadd (!%p325_p0), %s243_s9, 4294966784  ;;  %p18_p2 = scmp.ge.s32.totalorder %s521_s20, 4   ;;  %s671_s16 = smov %s454_s17 }
  0x5e   : > { %s672_s17 = smov %s458_s18  ;;  %s673_s18 = smov %s533_s23 }
  0x5f   : > { %s674_s19 = smov %s521_s20  ;;  %20 = sbr.rel (!%p18_p2) target bundleno = 8 (0x8), region = 77 }
  0x66   :  { %248 = vsyncpa [#allocation5], 1 }
  0x67   :  { %250 = vsyncpa [#allocation5 + $0x1], 1 }
  0x68   :  { %251 = vsyncpa [#allocation6], 1 }
  0x69   :  { %253 = vsyncpa [#allocation6 + $0x1], 1 }

</bundles_post_ra>
